<compile_context>
chip_gen: v7x
topology: tpu7x:2x2x1
jax: 0.10.0
libtpu: 0.0.40
codegen_flags: <defaults>
</compile_context>

<pallas_src>
import functools

import jax
import jax.numpy as jnp
from jax import lax
from jax.experimental import pallas as pl
from jax.experimental.pallas import tpu as pltpu


_LN_EPS = 1e-5                      # torch nn.LayerNorm default
_VMEM_LIMIT = 48 * 1024 * 1024      # below v7x physical (64 MiB), above v5e default (16 MiB)


def _round_up(x, m):
    return ((x + m - 1) // m) * m


def _sublane(dtype):
    """Dtype-aware sublane tile: 8 for 4-byte, 16 for 2-byte, 32 for 1-byte."""
    return {4: 8, 2: 16, 1: 32}.get(jnp.dtype(dtype).itemsize, 8)


def _pick_tm(rows, dtype, tm_max):
    """Row-tile: multiple of the dtype sublane, as large as tm_max, but with
    >=2 grid steps whenever possible (v7x shards the parallel axis over 2 TCs)."""
    sl = _sublane(dtype)
    tm = min(tm_max, _round_up(rows, sl))
    while pl.cdiv(rows, tm) < 2 and tm > sl:
        tm = _round_up(max(tm // 2, sl), sl)
    return tm


def _pick_tf(F, tf_max):
    """F (reduction) tile: a multiple of 128 that divides F exactly, so no
    garbage columns can leak into the accumulated second matmul."""
    if F % 128 != 0:
        return F                     # single full-width block (== array dim)
    tf = max(128, (min(tf_max, F) // 128) * 128)
    while F % tf != 0:
        tf -= 128
    return tf


# ----------------------------------------------------------------------------
# Kernel 1: LayerNorm over the last (feature) dim — generic Sublayer path.
# ----------------------------------------------------------------------------
def _layernorm_kernel(x_ref, g_ref, b_ref, o_ref, *, rows, tm):
    x = x_ref[...].astype(jnp.float32)
    if rows % tm != 0:
        # Zero the rows of the (partial) last block that fall outside the array;
        # their writes are masked by Pallas, this just keeps the math finite.
        rid = pl.program_id(0) * tm + lax.broadcasted_iota(jnp.int32, x.shape, 0)
        x = jnp.where(rid < rows, x, 0.0)
    # Two independent lane reductions (mean and E[x^2]) instead of a serial chain.
    mu = jnp.mean(x, axis=-1, keepdims=True)
    ex2 = jnp.mean(x * x, axis=-1, keepdims=True)
    var = ex2 - mu * mu
    y = (x - mu) * lax.rsqrt(var + _LN_EPS)          # rsqrt -> EUP slot
    o_ref[...] = (y * g_ref[...] + b_ref[...]).astype(o_ref.dtype)


def layernorm(x, gamma, beta, *, tm_max=1024):
    """x: (B, L, H) -> LayerNorm(x) over H, via Pallas (no pad/slice HBM copies)."""
    B, L, H = x.shape
    rows = B * L
    x2 = x.reshape(rows, H)
    tm = _pick_tm(rows, x.dtype, tm_max)
    grid = (pl.cdiv(rows, tm),)

    out = pl.pallas_call(
        functools.partial(_layernorm_kernel, rows=rows, tm=tm),
        out_shape=jax.ShapeDtypeStruct((rows, H), x.dtype),
        grid_spec=pltpu.PrefetchScalarGridSpec(
            num_scalar_prefetch=0,
            grid=grid,
            in_specs=[
                pl.BlockSpec((tm, H), lambda i: (i, 0)),
                pl.BlockSpec((1, H), lambda i: (0, 0)),
                pl.BlockSpec((1, H), lambda i: (0, 0)),
            ],
            out_specs=pl.BlockSpec((tm, H), lambda i: (i, 0)),
        ),
        compiler_params=pltpu.CompilerParams(
            dimension_semantics=("parallel",),
            vmem_limit_bytes=_VMEM_LIMIT),
    )(x2, gamma.reshape(1, H), beta.reshape(1, H))
    return out.reshape(B, L, H)


# ----------------------------------------------------------------------------
# Kernel 2: fully fused Sublayer with a position-wise FFN sub:
#   Dropout_eval( relu(LayerNorm(x) @ W1 + b1) @ W2 + b2 )
# LN affine is folded into (W1', b1').  Grid = (row_blocks, F_blocks); the F
# axis is a reduction with an f32 accumulator scratch (bounds weight VMEM).
# ----------------------------------------------------------------------------
def _sublayer_ffn_kernel(x_ref, w1_ref, b1_ref, w2_ref, b2_ref, o_ref,
                         y_scr, acc_scr, *, rows, tm):
    kf = pl.program_id(1)

    @pl.when(kf == 0)
    def _():
        # LayerNorm (no affine — folded into W1'/b1') once per row block.
        x = x_ref[...].astype(jnp.float32)
        if rows % tm != 0:
            rid = pl.program_id(0) * tm + lax.broadcasted_iota(jnp.int32, x.shape, 0)
            x = jnp.where(rid < rows, x, 0.0)
        mu = jnp.mean(x, axis=-1, keepdims=True)
        ex2 = jnp.mean(x * x, axis=-1, keepdims=True)
        var = ex2 - mu * mu
        y_scr[...] = (x - mu) * lax.rsqrt(var + _LN_EPS)
        acc_scr[...] = jnp.zeros_like(acc_scr)

    # bf16 MXU operands, f32 accumulation.
    h = jnp.dot(y_scr[...].astype(jnp.bfloat16), w1_ref[...],
                preferred_element_type=jnp.float32)
    h = jnp.maximum(h + b1_ref[...], 0.0)
    acc_scr[...] += jnp.dot(h.astype(jnp.bfloat16), w2_ref[...],
                            preferred_element_type=jnp.float32)

    @pl.when(kf == pl.num_programs(1) - 1)
    def _():
        # F.dropout(training=False) -> identity
        o_ref[...] = (acc_scr[...] + b2_ref[...]).astype(o_ref.dtype)


def sublayer_ffn(x, gamma, beta, w1, b1, w2, b2, *,
                 drop_prob=0.0, training=False, tm_max=512, tf_max=512):
    """Fused Sublayer forward with an FFN sub (swap=False path). x: (B, L, H)."""
    assert not (training and drop_prob > 0.0), \
        "TODO(synk): training-mode dropout needs pltpu.prng_* inside the kernel"
    B, L, H = x.shape
    F = w1.shape[1]
    rows = B * L
    x2 = x.reshape(rows, H)

    # Fold LN affine into the first linear (host-side, f32), then bf16 weights.
    f32 = jnp.float32
    w1p = (gamma.astype(f32)[:, None] * w1.astype(f32)).astype(jnp.bfloat16)
    b1p = (b1.astype(f32) + beta.astype(f32) @ w1.astype(f32)).reshape(1, F)
    w2b = w2.astype(jnp.bfloat16)
    b2r = b2.astype(f32).reshape(1, H)

    tm = _pick_tm(rows, x.dtype, tm_max)
    tf = _pick_tf(F, tf_max)
    grid = (pl.cdiv(rows, tm), F // tf)

    out = pl.pallas_call(
        functools.partial(_sublayer_ffn_kernel, rows=rows, tm=tm),
        out_shape=jax.ShapeDtypeStruct((rows, H), x.dtype),
        grid_spec=pltpu.PrefetchScalarGridSpec(
            num_scalar_prefetch=0,
            grid=grid,
            in_specs=[
                pl.BlockSpec((tm, H), lambda i, kf: (i, 0)),   # x rows (resident over kf)
                pl.BlockSpec((H, tf), lambda i, kf: (0, kf)),  # W1' slab
                pl.BlockSpec((1, tf), lambda i, kf: (0, kf)),  # b1' slab
                pl.BlockSpec((tf, H), lambda i, kf: (kf, 0)),  # W2 slab
                pl.BlockSpec((1, H), lambda i, kf: (0, 0)),    # b2
            ],
            out_specs=pl.BlockSpec((tm, H), lambda i, kf: (i, 0)),
            scratch_shapes=[
                pltpu.VMEM((tm, H), jnp.float32),   # LN(x) stash (reused across kf)
                pltpu.VMEM((tm, H), jnp.float32),   # output accumulator
            ],
        ),
        compiler_params=pltpu.CompilerParams(
            dimension_semantics=("parallel", "arbitrary"),
            vmem_limit_bytes=_VMEM_LIMIT),
    )(x2, w1p, b1p, w2b, b2r)
    return out.reshape(B, L, H)


# ----------------------------------------------------------------------------
# Generic Sublayer wrapper (arbitrary `sub` callable, optional swap transpose)
# ----------------------------------------------------------------------------
def init_sublayer(layer_list, drop_prob=0.1):
    """Mirrors Sublayer.__init__: bump shared id, pick dropout p by parity."""
    layer_list[0] = layer_list[0] + 1
    layer_id = layer_list[0]
    return drop_prob if layer_id % 2 == 1 else 0.0


def sublayer_forward(x, sub, gamma, beta, *, swap=False,
                     drop_prob=0.0, training=False):
    """Dropout( sub( LayerNorm(x) [transposed if swap] ) [transposed back] )."""
    y = layernorm(x, gamma, beta)                  # Pallas kernel
    if swap:
        # TODO(synk): when `sub` is known, express it over the native (B,L,H)
        # layout (einsum/dot_general) to avoid these two HBM transpose copies.
        z = jnp.swapaxes(sub(jnp.swapaxes(y, 1, 2)), 1, 2)
    else:
        z = sub(y)
    # F.dropout eval-mode -> identity.
    # TODO(synk): training-mode dropout (inverted mask) would use pltpu.prng_*.
    del drop_prob, training
    return z


# ----------------------------------------------------------------------------
# Pure-JAX reference (same math, no Pallas, f32 everywhere)
# ----------------------------------------------------------------------------
def layernorm_ref(x, gamma, beta):
    mu = jnp.mean(x, axis=-1, keepdims=True)
    var = jnp.mean((x - mu) ** 2, axis=-1, keepdims=True)
    return (x - mu) / jnp.sqrt(var + _LN_EPS) * gamma + beta


def sublayer_reference(x, sub, gamma, beta, *, swap=False):
    y = layernorm_ref(x, gamma, beta)
    if swap:
        return jnp.swapaxes(sub(jnp.swapaxes(y, 1, 2)), 1, 2)
    return sub(y)


# ----------------------------------------------------------------------------
if __name__ == "__main__":
    # small shapes consistent with the module: (batch, seq_len, hidden)
    B, L, H, F = 2, 8, 128, 256

    key = jax.random.PRNGKey(0)
    ks = jax.random.split(key, 8)
    x = jax.random.normal(ks[0], (B, L, H), jnp.float32)
    gamma = 1.0 + 0.1 * jax.random.normal(ks[1], (H,), jnp.float32)
    beta = 0.1 * jax.random.normal(ks[2], (H,), jnp.float32)
    # position-wise FFN sublayer weights (stored (in, out): y = x @ W)
    w1 = jax.random.normal(ks[3], (H, F), jnp.float32) * jnp.sqrt(2.0 / H)
    b1 = 0.01 * jax.random.normal(ks[4], (F,), jnp.float32)
    w2 = jax.random.normal(ks[5], (F, H), jnp.float32) * jnp.sqrt(2.0 / F)
    b2 = 0.01 * jax.random.normal(ks[6], (H,), jnp.float32)
    # channels-first mixing sub for the swap=True path
    w_mix = jax.random.normal(ks[7], (H, H), jnp.float32) * jnp.sqrt(1.0 / H)

    layer_list = [0]

    # ---- (a) fused path: LayerNorm + FFN sub + eval-dropout, one pallas_call
    p1 = init_sublayer(layer_list, 0.1)            # id=1 -> p=0.1 (identity at eval)
    out_fused = jax.block_until_ready(
        sublayer_ffn(x, gamma, beta, w1, b1, w2, b2, drop_prob=p1, training=False))

    ffn_sub = lambda y: jnp.maximum(y @ w1 + b1, 0.0) @ w2 + b2
    ref_fused = sublayer_reference(x, ffn_sub, gamma, beta, swap=False)
    assert out_fused.shape == (B, L, H), out_fused.shape
    # bf16 MXU operands -> looser tolerance than the all-f32 reference
    assert jnp.allclose(out_fused, ref_fused, rtol=5e-2, atol=5e-2), \
        float(jnp.max(jnp.abs(out_fused - ref_fused)))

    # ---- (b) generic path with swap=True: Pallas LayerNorm + arbitrary sub
    p2 = init_sublayer(layer_list, 0.1)            # id=2 -> p=0.0
    cf_sub = lambda z: jnp.einsum("bcl,cd->bdl", z, w_mix)   # expects (B, H, L)
    out_gen = jax.block_until_ready(
        sublayer_forward(x, cf_sub, gamma, beta, swap=True,
                         drop_prob=p2, training=False))
    ref_gen = sublayer_reference(x, cf_sub, gamma, beta, swap=True)
    assert out_gen.shape == (B, L, H), out_gen.shape
    assert jnp.allclose(out_gen, ref_gen, rtol=2e-2, atol=2e-3), \
        float(jnp.max(jnp.abs(out_gen - ref_gen)))

    print("KERNEL_OK")
</pallas_src>

<mosaic_0001>
module attributes {stable_mosaic.version = 11 : i64} {
  func.func @_sublayer_ffn_kernel(%arg0: i32, %arg1: i32, %arg2: memref<8x128xf32, #tpu.memory_space<vmem>>, %arg3: memref<128x256xbf16, #tpu.memory_space<vmem>>, %arg4: memref<1x256xf32, #tpu.memory_space<vmem>>, %arg5: memref<256x128xbf16, #tpu.memory_space<vmem>>, %arg6: memref<1x128xf32, #tpu.memory_space<vmem>>, %arg7: memref<8x128xf32, #tpu.memory_space<vmem>>, %arg8: memref<8x128xf32, #tpu.memory_space<vmem>>, %arg9: memref<8x128xf32, #tpu.memory_space<vmem>>) attributes {dimension_semantics = [#tpu.dimension_semantics<parallel>, #tpu.dimension_semantics<arbitrary>], iteration_bounds = array<i64: 2, 1>, scalar_prefetch = 0 : i64, scratch_operands = 2 : i64, tpu.core_type = #tpu.core_type<tc>, window_params = [{transform_indices = @transform_0, window_bounds = array<i64: 8, 128>}, {transform_indices = @transform_1, window_bounds = array<i64: 128, 256>}, {transform_indices = @transform_2, window_bounds = array<i64: 1, 256>}, {transform_indices = @transform_3, window_bounds = array<i64: 256, 128>}, {pipeline_mode = #tpu.pipeline_mode<synchronous>, transform_indices = @transform_4, window_bounds = array<i64: 1, 128>}, {transform_indices = @transform_5, window_bounds = array<i64: 8, 128>}]} {
    %c0_i32 = arith.constant 0 : i32
    %0 = arith.cmpi eq, %arg1, %c0_i32 : i32
    %1 = arith.extui %0 : i1 to i32
    %c0_i32_0 = arith.constant 0 : i32
    %2 = arith.cmpi ne, %1, %c0_i32_0 : i32
    scf.if %2 {
      %c0_16 = arith.constant 0 : index
      %c0_17 = arith.constant 0 : index
      %21 = vector.load %arg2[%c0_16, %c0_17] : memref<8x128xf32, #tpu.memory_space<vmem>>, vector<8x128xf32>
      %cst_18 = arith.constant dense<0.000000e+00> : vector<8xf32>
      %22 = vector.multi_reduction <add>, %21, %cst_18 [1] : vector<8x128xf32> to vector<8xf32>
      %23 = vector.shape_cast %22 : vector<8xf32> to vector<8x1xf32>
      %cst_19 = arith.constant 1.280000e+02 : f32
      %24 = vector.broadcast %cst_19 : f32 to vector<8x1xf32>
      %25 = arith.divf %23, %24 : vector<8x1xf32>
      %26 = arith.mulf %21, %21 : vector<8x128xf32>
      %cst_20 = arith.constant dense<0.000000e+00> : vector<8xf32>
      %27 = vector.multi_reduction <add>, %26, %cst_20 [1] : vector<8x128xf32> to vector<8xf32>
      %28 = vector.shape_cast %27 : vector<8xf32> to vector<8x1xf32>
      %cst_21 = arith.constant 1.280000e+02 : f32
      %29 = vector.broadcast %cst_21 : f32 to vector<8x1xf32>
      %30 = arith.divf %28, %29 : vector<8x1xf32>
      %31 = arith.mulf %25, %25 : vector<8x1xf32>
      %32 = arith.subf %30, %31 : vector<8x1xf32>
      %33 = vector.broadcast %25 : vector<8x1xf32> to vector<8x128xf32>
      %34 = arith.subf %21, %33 : vector<8x128xf32>
      %cst_22 = arith.constant 9.99999974E-6 : f32
      %35 = vector.broadcast %cst_22 : f32 to vector<8x1xf32>
      %36 = arith.addf %32, %35 : vector<8x1xf32>
      %37 = math.rsqrt %36 : vector<8x1xf32>
      %38 = vector.broadcast %37 : vector<8x1xf32> to vector<8x128xf32>
      %39 = arith.mulf %34, %38 : vector<8x128xf32>
      %c0_23 = arith.constant 0 : index
      %c0_24 = arith.constant 0 : index
      %40 = vector.load %arg8[%c0_23, %c0_24] : memref<8x128xf32, #tpu.memory_space<vmem>>, vector<8x128xf32>
      tpu.vector_store %arg8[%c0_23, %c0_24], %39 {strides = array<i32>} : memref<8x128xf32, #tpu.memory_space<vmem>>, vector<8x128xf32>,
      %cst_25 = arith.constant 0.000000e+00 : f32
      %41 = vector.broadcast %cst_25 : f32 to vector<8x128xf32>
      %c0_26 = arith.constant 0 : index
      %c0_27 = arith.constant 0 : index
      %42 = vector.load %arg9[%c0_26, %c0_27] : memref<8x128xf32, #tpu.memory_space<vmem>>, vector<8x128xf32>
      tpu.vector_store %arg9[%c0_26, %c0_27], %41 {strides = array<i32>} : memref<8x128xf32, #tpu.memory_space<vmem>>, vector<8x128xf32>,
    } else {
    }
    %c0 = arith.constant 0 : index
    %c0_1 = arith.constant 0 : index
    %3 = vector.load %arg8[%c0, %c0_1] : memref<8x128xf32, #tpu.memory_space<vmem>>, vector<8x128xf32>
    %4 = arith.truncf %3 : vector<8x128xf32> to vector<8x128xbf16>
    %c0_2 = arith.constant 0 : index
    %c0_3 = arith.constant 0 : index
    %5 = vector.load %arg3[%c0_2, %c0_3] : memref<128x256xbf16, #tpu.memory_space<vmem>>, vector<128x256xbf16>
    %cst = arith.constant dense<0.000000e+00> : vector<8x256xf32>
    %6 = tpu.matmul %4, %5, %cst {dimension_numbers = #tpu.dot_dimension_numbers<[1], [0], [0], [1], [0, 0, 1, 1], [], []>} : vector<8x128xbf16>, vector<128x256xbf16>, vector<8x256xf32> -> vector<8x256xf32>
    %c0_4 = arith.constant 0 : index
    %c0_5 = arith.constant 0 : index
    %7 = vector.load %arg4[%c0_4, %c0_5] : memref<1x256xf32, #tpu.memory_space<vmem>>, vector<1x256xf32>
    %8 = vector.broadcast %7 : vector<1x256xf32> to vector<8x256xf32>
    %9 = arith.addf %6, %8 : vector<8x256xf32>
    %cst_6 = arith.constant 0.000000e+00 : f32
    %10 = vector.broadcast %cst_6 : f32 to vector<8x256xf32>
    %11 = arith.maximumf %9, %10 : vector<8x256xf32>
    %c0_7 = arith.constant 0 : index
    %c0_8 = arith.constant 0 : index
    %12 = vector.load %arg9[%c0_7, %c0_8] : memref<8x128xf32, #tpu.memory_space<vmem>>, vector<8x128xf32>
    %13 = arith.truncf %11 : vector<8x256xf32> to vector<8x256xbf16>
    %c0_9 = arith.constant 0 : index
    %c0_10 = arith.constant 0 : index
    %14 = vector.load %arg5[%c0_9, %c0_10] : memref<256x128xbf16, #tpu.memory_space<vmem>>, vector<256x128xbf16>
    %cst_11 = arith.constant dense<0.000000e+00> : vector<8x128xf32>
    %15 = tpu.matmul %13, %14, %cst_11 {dimension_numbers = #tpu.dot_dimension_numbers<[1], [0], [0], [1], [0, 0, 1, 1], [], []>} : vector<8x256xbf16>, vector<256x128xbf16>, vector<8x128xf32> -> vector<8x128xf32>
    %16 = arith.addf %12, %15 : vector<8x128xf32>
    %c0_12 = arith.constant 0 : index
    %c0_13 = arith.constant 0 : index
    %17 = vector.load %arg9[%c0_12, %c0_13] : memref<8x128xf32, #tpu.memory_space<vmem>>, vector<8x128xf32>
    tpu.vector_store %arg9[%c0_12, %c0_13], %16 {strides = array<i32>} : memref<8x128xf32, #tpu.memory_space<vmem>>, vector<8x128xf32>,
    %c0_i32_14 = arith.constant 0 : i32
    %18 = arith.cmpi eq, %arg1, %c0_i32_14 : i32
    %19 = arith.extui %18 : i1 to i32
    %c0_i32_15 = arith.constant 0 : i32
    %20 = arith.cmpi ne, %19, %c0_i32_15 : i32
    scf.if %20 {
      %c0_16 = arith.constant 0 : index
      %c0_17 = arith.constant 0 : index
      %21 = vector.load %arg9[%c0_16, %c0_17] : memref<8x128xf32, #tpu.memory_space<vmem>>, vector<8x128xf32>
      %c0_18 = arith.constant 0 : index
      %c0_19 = arith.constant 0 : index
      %22 = vector.load %arg6[%c0_18, %c0_19] : memref<1x128xf32, #tpu.memory_space<vmem>>, vector<1x128xf32>
      %23 = vector.broadcast %22 : vector<1x128xf32> to vector<8x128xf32>
      %24 = arith.addf %21, %23 : vector<8x128xf32>
      %c0_20 = arith.constant 0 : index
      %c0_21 = arith.constant 0 : index
      %25 = vector.load %arg7[%c0_20, %c0_21] : memref<8x128xf32, #tpu.memory_space<vmem>>, vector<8x128xf32>
      tpu.vector_store %arg7[%c0_20, %c0_21], %24 {strides = array<i32>} : memref<8x128xf32, #tpu.memory_space<vmem>>, vector<8x128xf32>,
    } else {
    }
    return
  }
  func.func @transform_0(%arg0: i32, %arg1: i32) -> (i32, i32) {
    %c0_i32 = arith.constant 0 : i32
    %c0_i32_0 = arith.constant 0 : i32
    return %arg0, %c0_i32 : i32, i32
  }
  func.func @transform_1(%arg0: i32, %arg1: i32) -> (i32, i32) {
    %c0_i32 = arith.constant 0 : i32
    %c0_i32_0 = arith.constant 0 : i32
    return %c0_i32, %arg1 : i32, i32
  }
  func.func @transform_2(%arg0: i32, %arg1: i32) -> (i32, i32) {
    %c0_i32 = arith.constant 0 : i32
    %c0_i32_0 = arith.constant 0 : i32
    return %c0_i32, %arg1 : i32, i32
  }
  func.func @transform_3(%arg0: i32, %arg1: i32) -> (i32, i32) {
    %c0_i32 = arith.constant 0 : i32
    %c0_i32_0 = arith.constant 0 : i32
    return %arg1, %c0_i32 : i32, i32
  }
  func.func @transform_4(%arg0: i32, %arg1: i32) -> (i32, i32) {
    %c0_i32 = arith.constant 0 : i32
    %c0_i32_0 = arith.constant 0 : i32
    %c0_i32_1 = arith.constant 0 : i32
    return %c0_i32, %c0_i32_0 : i32, i32
  }
  func.func @transform_5(%arg0: i32, %arg1: i32) -> (i32, i32) {
    %c0_i32 = arith.constant 0 : i32
    %c0_i32_0 = arith.constant 0 : i32
    return %arg0, %c0_i32 : i32, i32
  }
}

</mosaic_0001>

<bundles_post_ra>
// kernel: tpu_custom_call.1
= control target key start
LH: loop header
LB: loop body
LE: loop exit
PB: predicated region body
PF: predicated region fallthrough
CT: control target
= control target key end

     0   :  { %10 = vsyncpa [#allocation5], 0  ;;  %s1488_s0 = inlined_call_operand.hbm [shape: f32[16,128], index: 0, kind: input, shape index: {}]   ;;  %s1489_s1 = inlined_call_operand.hbm [shape: bf16[128,256], index: 1, kind: input, shape index: {}]   ;;  %s1490_s2 = inlined_call_operand.vmem [shape: f32[1,256], index: 2, kind: input, shape index: {}]   ;;  %s1491_s3 = inlined_call_operand.hbm [shape: bf16[256,128], index: 3, kind: input, shape index: {}]   ;;  %s1492_s4 = inlined_call_operand.vmem [shape: f32[1,128], index: 4, kind: input, shape index: {}]   ;;  %s1493_s5 = inlined_call_operand.hbm [shape: f32[16,128], index: 5, kind: output, shape index: {}]  }
   0x1   :  { %12 = vsyncpa [#allocation5 + $0x1], 0 }
   0x2   :  { %13 = vsyncpa [#allocation8], 0 }
   0x3   :  { %14 = vsyncpa [#allocation6], 0 }
   0x4   :  { %16 = vsyncpa [#allocation6 + $0x1], 0  ;;  %s1222_s18 = smov 0   ;;  %s1224_s19 = smov 0  }
   0x5   :  { %s1226_s20 = smov 0   ;;  %s1228_s21 = smov 0  }
   0x6   :  { %s1230_s22 = smov 0   ;;  %s1232_s23 = smov 0  }
   0x7 LB: > { %s806_s24 = sadd.s32 4294967295, %s1181_s23   ;;  %s807_s25 = sadd.s32 4294967294, %s1181_s23   ;;  %s1181_s23 = sphi %s1232_s23, %s22_s23   ;;  %s1177_s22 = sphi %s1230_s22, %s1515_s22   ;;  %s1173_s21 = sphi %s1228_s21, %s1514_s21   ;;  %s1169_s20 = sphi %s1226_s20, %s1513_s20   ;;  %s1165_s19 = sphi %s1224_s19, %s1512_s19   ;;  %s1161_s18 = sphi %s1222_s18, %s1511_s18  }
   0x8   : > { %p54_p0 = scmp.ne.s32.totalorder %s1165_s19, %s1161_s18  ;;  %p1256_p1 = scmp.eq.s32.totalorder %s806_s24, 0 }
   0x9   : > { %p1260_p2 = scmp.eq.s32.totalorder %s806_s24, 1  ;;  %p183_p3 = scmp.eq.s32.totalorder %s807_s25, 1 }
   0xa   : > { %s1498_s26 = scalar_select %p1256_p1, 1, 0 }
   0xb   : > { %p1266_p4 = por %p1256_p1, %p54_p0  ;;  %p808_p5 = scmp.ge.s32.totalorder %s1181_s23, 1 }
   0xc   : > { %p1271_p6 = por %p183_p3, %p54_p0  ;;  %p190_p7 = scmp.lt.s32.totalorder %s1181_s23, 3 }
   0xd   : > { %s1500_s28 = scalar_select %p1266_p4, 1, 0 }
   0xe   : > { %s1501_s29 = scalar_select %p1271_p6, 1, 0 }
   0xf   : > { %p1276_p8 = pnand %p808_p5, %p190_p7  ;;  %s1183_s6 = smov [#allocation7]  }
  0x10   : > { %s205_s7 = sshll.u32 %s1183_s6, 4  ;;  %s1184_s9 = smov [#allocation9]   ;;  %s1280_s7 = int_to_ptr.vmem [resolvable:$true] %s205_s7 }
  0x11   : > { %p891_p9 = pneg %p1276_p8  ;;  %s229_s10 = sshll.u32 %s1184_s9, 4  ;;  %s1291_s10 = int_to_ptr.vmem [resolvable:$true] %s229_s10 }
  0x12   : > { %s1009_s13 = scalar_lea.hbm %s1489_s1, 2048 }
  0x13   : > { %p1287_p11 = pnand %p891_p9, %p1256_p1  ;;  %p1010_p12 = scmp.ne.s32.totalorder %s1489_s1, %s1009_s13 }
  0x14   : > { %p1016_p5 = scmp.lt.u32.totalorder %s1009_s13, %s1489_s1 }
  0x15   : > { %p1011_p13 = pneg %p1287_p11 }
  0x17   : > { %p1012_p0 = pnand %p1011_p13, %p1010_p12 }
  0x19   : > { %p1013_p3 = pneg %p1012_p0 }
  0x1b   : > { %p1018_p7 = pnand %p1016_p5, %p1013_p3 }
  0x1d   : > { %1021 = shalt.err (!%p1018_p7)
}
  0x1e   : > { %s1022_s24 = scalar_lea.vmem %s1280_s7, 2048  ;;  %p1030_p1 = scmp.lt.s32.totalorder %s1280_s7, %s1280_s7 }
  0x1f   : > { %p1023_p9 = scmp.ne.s32.totalorder %s1280_s7, %s1022_s24  ;;  %p1031_p12 = scmp.lt.s32.totalorder %s1022_s24, %s1022_s24 }
  0x21   : > { %p1025_p10 = pnand %p1023_p9, %p1011_p13  ;;  %p1032_p0 = por %p1031_p12, %p1030_p1 }
  0x23   : > { %p1026_p6 = pneg %p1025_p10 }
  0x25   : > { %p1033_p4 = pnand %p1032_p0, %p1026_p6 }
  0x27   : > { %1036 = shalt.err (!%p1033_p4)
}
  0x28   : > { %s1185_s25 = smov 128   ;;  %s1186_s6 = smov 8  }
  0x29   : > { %894 = dma.hbm_to_vmem [thread:$0]  (!%p1287_p11), %s1489_s1, 2048, %s1280_s7, [#allocation8], %s1185_s25, %s1185_s25, %s1186_s6  }
  0x2a   : > { %s1037_s14 = scalar_lea.hbm %s1491_s3, 2048 }
  0x2b   : > { %p1038_p1 = scmp.ne.s32.totalorder %s1491_s3, %s1037_s14  ;;  %p1044_p10 = scmp.lt.u32.totalorder %s1037_s14, %s1491_s3 }
  0x2d   : > { %p1040_p4 = pnand %p1038_p1, %p1011_p13 }
  0x2f   : > { %p1041_p6 = pneg %p1040_p4 }
  0x31   : > { %p1046_p3 = pnand %p1044_p10, %p1041_p6 }
  0x33   : > { %1049 = shalt.err (!%p1046_p3)
}
  0x34   : > { %s1050_s7 = scalar_lea.vmem %s1291_s10, 2048  ;;  %p1058_p12 = scmp.lt.s32.totalorder %s1291_s10, %s1291_s10 }
  0x35   : > { %p1051_p5 = scmp.ne.s32.totalorder %s1291_s10, %s1050_s7  ;;  %p1059_p0 = scmp.lt.s32.totalorder %s1050_s7, %s1050_s7 }
  0x37   : > { %p1053_p7 = pnand %p1051_p5, %p1011_p13  ;;  %p1060_p1 = por %p1059_p0, %p1058_p12 }
  0x39   : > { %p1054_p9 = pneg %p1053_p7 }
  0x3b   : > { %p1061_p4 = pnand %p1060_p1, %p1054_p9 }
  0x3d   : > { %1064 = shalt.err (!%p1061_p4)
}
  0x3e   : > { %s1187_s25 = smov 64   ;;  %s1188_s6 = smov 4  }
  0x3f   : > { %897 = dma.hbm_to_vmem [thread:$0]  (!%p1287_p11), %s1491_s3, 2048, %s1291_s10, [#allocation8], %s1187_s25, %s1187_s25, %s1188_s6  }
  0x40   : > { %s34_s12 = sadd.s32 1, %s1177_s22  ;;  %s41_s13 = sadd.s32 1, %s1169_s20 }
  0x41   : > { %p36_p13 = scmp.ge.s32.totalorder %s34_s12, 2  ;;  %p48_p6 = scmp.ne.s32.totalorder %s1169_s20, %s1165_s19 }
  0x42   : > { %p49_p10 = scmp.eq.s32.totalorder %s1181_s23, 0  ;;  %p908_p3 = scmp.lt.s32.totalorder %s1181_s23, 2 }
  0x43   : > { %s1517_s12 = smov (%p36_p13, %s34_s12), 0  ;;  %p1355_p7 = por %p1260_p2, %p48_p6 }
  0x44   : > { %p50_p5 = por %p49_p10, %p48_p6  ;;  %s38_s8 = ssub.s32 %s1177_s22, %s1517_s12 }
  0x45   : > { %s1504_s14 = scalar_select %p1355_p7, 1, 0 }
  0x46   : > { %s246_s15 = sand.u32 1, %s1169_s20   ;;  %p39_p9 = scmp.eq.s32.totalorder %s38_s8, 0 }
  0x47   : > { %s813_s10 = sshll.u32 %s246_s15, 3  ;;  %s814_s16 = sshll.u32 %s1177_s22, 7 }
  0x48   : > { %s1364_s17 = scalar_select %p39_p9, %s1169_s20, %s41_s13  }
  0x49   : > { %s1369_s25 = scalar_lea.hbm %s1488_s0, %s814_s16  ;;  %s250_s27 = scalar_lea.vmem [#allocation4], %s813_s10 }
  0x4a   : > { %s257_s6 = sshll.u32 %s250_s27, 4  ;;  %p1373_p2 = pnand %p908_p3, %p50_p5  ;;  %s1377_s6 = int_to_ptr.vmem [resolvable:$true] %s257_s6 }
  0x4b   : > { %s247_s11 = scalar_lea.sflag [#allocation5], %s246_s15  ;;  %s1065_s13 = scalar_lea.hbm %s1369_s25, 128 }
  0x4c   : > { %p1066_p11 = scmp.ne.s32.totalorder %s1369_s25, %s1065_s13  ;;  %p1067_p12 = pneg %p1373_p2 }
  0x4d   : > { %s1070_s16 = scalar_lea.hbm %s1488_s0, 256  ;;  %p1071_p4 = scmp.lt.u32.totalorder %s1369_s25, %s1488_s0 }
  0x4e   : > { %p1068_p0 = pnand %p1067_p12, %p1066_p11  ;;  %p1072_p13 = scmp.lt.u32.totalorder %s1070_s16, %s1065_s13 }
  0x4f   : > { %p1074_p10 = scmp.lt.u32.totalorder %s1065_s13, %s1369_s25 }
  0x50   : > { %p1069_p1 = pneg %p1068_p0  ;;  %p1073_p6 = por %p1072_p13, %p1071_p4 }
  0x52   : > { %p1075_p3 = por %p1074_p10, %p1073_p6 }
  0x54   : > { %p1076_p5 = pnand %p1075_p3, %p1069_p1 }
  0x56   : > { %1079 = shalt.err (!%p1076_p5)
}
  0x57   : > { %s1080_s15 = scalar_lea.vmem %s1377_s6, 128  ;;  %s1189_s27 = smov [#allocation4]  }
  0x58   : > { %p1081_p9 = scmp.ne.s32.totalorder %s1377_s6, %s1080_s15  ;;  %s1085_s8 = sshll.u32 %s1189_s27, 4  ;;  %s1086_s8 = int_to_ptr.vmem [resolvable:$false] %s1085_s8 }
  0x59   : > { %s1087_s10 = scalar_lea.vmem %s1086_s8, 256  ;;  %p1088_p7 = scmp.lt.s32.totalorder %s1377_s6, %s1086_s8 }
  0x5a   : > { %p1083_p11 = pnand %p1081_p9, %p1067_p12  ;;  %p1089_p4 = scmp.lt.s32.totalorder %s1087_s10, %s1080_s15 }
  0x5c   : > { %p1084_p0 = pneg %p1083_p11  ;;  %p1090_p13 = por %p1089_p4, %p1088_p7 }
  0x5e   : > { %p1091_p6 = pnand %p1090_p13, %p1084_p0 }
  0x60   : > { %1094 = shalt.err (!%p1091_p6)
}
  0x61   : > { %901 = dma.hbm_to_vmem [thread:$0]  (!%p1373_p2), %s1369_s25, 128, %s1377_s6, %s247_s11  }
  0x62   : > { %266 = sbr.rel (%p1276_p8) target bundleno = 728 (0x2d8), region = 40  ;;  %s1407_s13 = sand.u32 (!%p1276_p8), 1, %s1165_s19  }
  0x63   : > { %s816_s16 = sshll.u32 (!%p1276_p8), %s1407_s13, 3  ;;  %s269_s24 = scalar_lea.sflag (!%p1276_p8), [#allocation5], %s1407_s13 }
  0x64   : > { %s272_s7 = scalar_lea.vmem (!%p1276_p8), [#allocation4], %s816_s16  ;;  %p1506_p7 = scmp.ne.s32.totalorder (!%p1276_p8), %s1500_s28, 0 }
  0x69   : > { %1148 = dma.done.wait (%p1506_p7), %s269_s24, 128  }
  0x6a   : > { %1150 = vsyncadd (%p1506_p7), %s269_s24, 4294967168  ;;  %p1507_p2 = scmp.ne.s32.totalorder %s1498_s26, 0 }
  0x6c   : > { %1152 = dma.done.wait (%p1507_p2), [#allocation8], 4096  }
  0x6d   : > { %1154 = vsyncadd (%p1507_p2), [#allocation8], 4294963200  ;;  %v1421_v0 = vld [vmem:[%s272_s7] sm:$0xff]  ;;  %v967_v2 = vld [vmem:[#allocation7 + $0x4] ss:$8 sps:$4 sm:$0xff]   ;;  %v1190_v15 = vmov 0   ;;  %v360_v46 = vlaneseq }
  0x6e   : > { %324 = vadd.xlane.f32.xlu0 %v1421_v0  ;;  %v328_v1 = vmul.f32 %v1421_v0, %v1421_v0  ;;  %v969_v3 = vld [vmem:[#allocation7] ss:$8 sps:$4 sm:$0xff]   ;;  %v970_v4 = vld [vmem:[#allocation7 + $0x14] ss:$8 sps:$4 sm:$0xff]   ;;  %v972_v5 = vld [vmem:[#allocation7 + $0x10] ss:$8 sps:$4 sm:$0xff]   ;;  %450 = vmatprep.subr.bf16.mxu0 %v967_v2 }
  0x6f   : > { %451 = vmatpush1.bf16.msra.mxu0 %v969_v3  ;;  %v973_v6 = vld [vmem:[#allocation7 + $0x24] ss:$8 sps:$4 sm:$0xff]   ;;  %v975_v7 = vld [vmem:[#allocation7 + $0x20] ss:$8 sps:$4 sm:$0xff]   ;;  %v976_v8 = vld [vmem:[#allocation7 + $0x34] ss:$8 sps:$4 sm:$0xff]   ;;  %482 = vmatprep.mubr.bf16.mxu0 %v1190_v15 }
  0x70   : > { %452 = vmatprep.subr.bf16.mxu0 %v970_v4  ;;  %v978_v9 = vld [vmem:[#allocation7 + $0x30] ss:$8 sps:$4 sm:$0xff]   ;;  %v979_v10 = vld [vmem:[#allocation7 + $0x44] ss:$8 sps:$4 sm:$0xff]   ;;  %v981_v11 = vld [vmem:[#allocation7 + $0x40] ss:$8 sps:$4 sm:$0xff]  }
  0x71   : > { %v982_v12 = vld [vmem:[#allocation7 + $0x54] ss:$8 sps:$4 sm:$0xff]   ;;  %v984_v13 = vld [vmem:[#allocation7 + $0x50] ss:$8 sps:$4 sm:$0xff]   ;;  %v985_v14 = vld [vmem:[#allocation7 + $0x64] ss:$8 sps:$4 sm:$0xff]  }
  0x72   : > { %329 = vadd.xlane.f32.xlu0 %v328_v1  ;;  %v987_v16 = vld [vmem:[#allocation7 + $0x60] ss:$8 sps:$4 sm:$0xff]   ;;  %v988_v17 = vld [vmem:[#allocation7 + $0x74] ss:$8 sps:$4 sm:$0xff]   ;;  %v990_v18 = vld [vmem:[#allocation7 + $0x70] ss:$8 sps:$4 sm:$0xff]  }
  0x73   : > { %453 = vmatpush1.bf16.msra.mxu0 %v972_v5  ;;  %v991_v19 = vld [vmem:[#allocation9 + $0x40] sm:$0xff]   ;;  %v993_v21 = vld [vmem:[#allocation9 + $0x48] sm:$0xff]   ;;  %v995_v23 = vld [vmem:[#allocation9 + $0x50] sm:$0xff]   ;;  %v361_v47 = vshrl.u32 %v360_v46, 7  ;;  %s854_s6 = sshll.u32 %s1173_s21, 7  ;;  %s310_s9 = scalar_lea.vmem [#allocation10], %s816_s16 }
  0x74   : > { %454 = vmatprep.subr.bf16.mxu0 %v973_v6  ;;  %v992_v20 = vld [vmem:[#allocation9] sm:$0xff]   ;;  %857 = vmatprep.subr.bf16.mxu1 %v991_v19  ;;  %v994_v22 = vld [vmem:[#allocation9 + $0x8] sm:$0xff]   ;;  %v996_v24 = vld [vmem:[#allocation9 + $0x10] sm:$0xff]   ;;  %s693_s11 = sshll.u32 %s310_s9, 4  ;;  %s1439_s8 = scalar_lea.hbm %s1493_s5, %s854_s6  ;;  %s1441_s11 = int_to_ptr.vmem [resolvable:$true] %s693_s11 }
  0x75   : > { %858 = vmatpush3.bf16.msra.mxu1 %v992_v20  ;;  %v997_v25 = vld [vmem:[#allocation9 + $0x58] sm:$0xff]   ;;  %v999_v27 = vld [vmem:[#allocation9 + $0x60] sm:$0xff]   ;;  %v1001_v29 = vld [vmem:[#allocation9 + $0x68] sm:$0xff]   ;;  %v362_v48 = vsub.s32 0, %v361_v47  ;;  %v366_v50 = vsub.s32 1, %v361_v47  ;;  %s680_s10 = scalar_lea.sflag [#allocation6], %s1407_s13 }
  0x76   : > { %859 = vmatprep.subr.bf16.mxu1 %v993_v21  ;;  %v998_v26 = vld [vmem:[#allocation9 + $0x18] sm:$0xff]   ;;  %v1000_v28 = vld [vmem:[#allocation9 + $0x20] sm:$0xff]   ;;  %v1002_v30 = vld [vmem:[#allocation9 + $0x28] sm:$0xff]   ;;  %s1095_s21 = scalar_lea.vmem %s1441_s11, 128  ;;  %p1508_p12 = scmp.ne.s32.totalorder %s1504_s14, 0 }
  0x77   : > { %455 = vmatpush1.bf16.msra.mxu0 %v975_v7  ;;  %v1003_v42 = vld [vmem:[#allocation9 + $0x70] sm:$0xff]   ;;  %v1005_v44 = vld [vmem:[#allocation9 + $0x78] sm:$0xff]   ;;  %p1096_p8 = scmp.ne.s32.totalorder %s1441_s11, %s1095_s21  ;;  %s1191_s16 = smov [#allocation10]  }
  0x78   : > { %456 = vmatprep.subr.bf16.mxu0 %v976_v8  ;;  %v1004_v43 = vld [vmem:[#allocation9 + $0x30] sm:$0xff]   ;;  %v1006_v45 = vld [vmem:[#allocation9 + $0x38] sm:$0xff]   ;;  %s1099_s24 = sshll.u32 %s1191_s16, 4  ;;  %s1100_s24 = int_to_ptr.vmem [resolvable:$false] %s1099_s24 }
  0x79   : > { %860 = vmatpush3.bf16.msra.mxu1 %v994_v22  ;;  %v358_v49 = vld [vmem:[%s1490_s2] sm:$0x3]  ;;  %p1097_p1 = pnand %p1096_p8, %p1508_p12  ;;  %s1101_s7 = scalar_lea.vmem %s1100_s24, 256 }
  0x7a   : > { %861 = vmatprep.subr.bf16.mxu1 %v995_v23  ;;  %v363_v51 = vrot.slane %v358_v49, %v362_v48  ;;  %v367_v52 = vrot.slane %v358_v49, %v366_v50  ;;  %v852_v1 = vld [vmem:[%s1492_s4] ss:$0 sm:$0xff]  ;;  %p1102_p3 = scmp.lt.s32.totalorder %s1441_s11, %s1100_s24  ;;  %p1103_p5 = scmp.lt.s32.totalorder %s1101_s7, %s1095_s21 }
  0x7b   : > { %457 = vmatpush1.bf16.msra.mxu0 %v978_v9  ;;  %p1098_p10 = pneg %p1097_p1 }
  0x7c   : > { %458 = vmatprep.subr.bf16.mxu0 %v979_v10  ;;  %p1104_p9 = por %p1103_p5, %p1102_p3 }
  0x7d   : > { %862 = vmatpush3.bf16.msra.mxu1 %v996_v24 }
  0x7e   : > { %863 = vmatprep.subr.bf16.mxu1 %v997_v25  ;;  %p1105_p11 = pnand %p1104_p9, %p1098_p10 }
  0x7f   : > { %459 = vmatpush1.bf16.msra.mxu0 %v981_v11 }
  0x80   : > { %460 = vmatprep.subr.bf16.mxu0 %v982_v12 }
  0x81   : > { %864 = vmatpush3.bf16.msra.mxu1 %v998_v26 }
  0x82   : > { %865 = vmatprep.subr.bf16.mxu1 %v999_v27 }
  0x83   : > { %461 = vmatpush1.bf16.msra.mxu0 %v984_v13 }
  0x84   : > { %462 = vmatprep.subr.bf16.mxu0 %v985_v14 }
  0x85   : > { %866 = vmatpush3.bf16.msra.mxu1 %v1000_v28 }
  0x86   : > { %867 = vmatprep.subr.bf16.mxu1 %v1001_v29 }
  0x87   : > { %463 = vmatpush1.bf16.msra.mxu0 %v987_v16 }
  0x88   : > { %464 = vmatprep.subr.bf16.mxu0 %v988_v17 }
  0x89   : > { %868 = vmatpush3.bf16.msra.mxu1 %v1002_v30 }
  0x8a   : > { %869 = vmatprep.subr.bf16.mxu1 %v1003_v42 }
  0x8b   : > { %465 = vmatpush1.bf16.msra.mxu0 %v990_v18 }
  0x8d   : > { %870 = vmatpush3.bf16.msra.mxu1 %v1004_v43 }
  0x8e   : > { %871 = vmatprep.subr.bf16.mxu1 %v1005_v44 }
  0x91   : > { %872 = vmatpush3.bf16.msra.mxu1 %v1006_v45 }
  0xfb   : > { %v325_v31 = vpop.xlane.xlu0 %324 }
  0xfc   : > { %v327_v32 = vmul.f32 0.0078125, %v325_v31 }
  0xfe   : > { %v332_v34 = vmul.f32 %v327_v32, %v327_v32  ;;  %v334_v38 = vsub.f32 %v1421_v0, %v327_v32 }
  0xff   : > { %v330_v33 = vpop.xlane.xlu0 %329 }
 0x100   : > { %v331_v35 = vmul.f32 0.0078125, %v330_v33 }
 0x102   : > { %v333_v36 = vsub.f32 %v331_v35, %v332_v34 }
 0x104   : > { %v335_v37 = vadd.f32 1e-05, %v333_v36 }
 0x106   : > { %1007 = vrsqrt.f32 %v335_v37 }
 0x110   : > { %v1008_v39 = vpop.eup %1007 }
 0x111   : > { %v337_v40 = vmul.f32 %v1008_v39, %v334_v38 }
 0x113   : > { %v341_v41 = vpack.c.bf16 %v337_v40, %v337_v40 }
 0x115   : > { %483 = vmatmul.mubr.bf16.vlgmr.msra.gmra.mrb[0].mxu0 %v341_v41 }
 0x1e8   : > { %v484_v53 = vpop.f32.mrb[0].mxu0 }
 0x1e9   : > { %v485_v54 = vadd.f32 %v484_v53, %v363_v51  ;;  %v486_v55 = vpop.f32.mrb[1].mxu0 }
 0x1ea   : > { %v487_v56 = vadd.f32 %v486_v55, %v367_v52  ;;  %v488_v57 = vpop.f32.mrb[2].mxu0 }
 0x1eb   : > { %v491_v58 = vmax.f32 %v485_v54, 0.0  ;;  %v489_v59 = vpop.f32.mrb[3].mxu0 }
 0x1ec   : > { %v492_v60 = vmax.f32 %v487_v56, 0.0 }
 0x1ed   : > { %v494_v62 = vpack.c.bf16 %v491_v58, %v491_v58 }
 0x1ee   : > { %v495_v61 = vpack.c.bf16 %v492_v60, %v492_v60 }
 0x1f0   : > { %656 = vmatprep.mubr.bf16.mxu1 %v495_v61 }
 0x1f1   : > { %657 = vmatmul.mubr.bf16.vlgmr.msra.gmra.mrb[0].mxu1 %v494_v62 }
 0x2c4   : > { %v873_v63 = vpop.f32.mrb[0].mxu1 }
 0x2c5   : > { %v874_v0 = vpop.f32.mrb[1].mxu1 }
 0x2c6   : > { %v875_v2 = vadd.f32 %v874_v0, %v873_v63  ;;  %v876_v3 = vpop.f32.mrb[2].mxu1 }
 0x2c7   : > { %v877_v4 = vpop.f32.mrb[3].mxu1 }
 0x2c8   : > { %v677_v5 = vadd.f32 %v875_v2, %v852_v1 }
 0x2ca   : > { %678 = vst [vmem:[%s310_s9] sm:$0xff] %v677_v5 }
 0x2cb   : > { %1108 = shalt.err (!%p1105_p11)
}
 0x2cc   : > { %s1109_s13 = scalar_lea.hbm %s1439_s8, 128  ;;  %s1113_s30 = scalar_lea.hbm %s1493_s5, 256 }
 0x2cd   : > { %p1110_p0 = scmp.ne.s32.totalorder %s1439_s8, %s1109_s13  ;;  %p1114_p6 = scmp.lt.u32.totalorder %s1439_s8, %s1493_s5 }
 0x2ce   : > { %p1115_p7 = scmp.lt.u32.totalorder %s1113_s30, %s1109_s13  ;;  %p1117_p8 = scmp.lt.u32.totalorder %s1109_s13, %s1439_s8 }
 0x2cf   : > { %p1111_p4 = pnand %p1110_p0, %p1508_p12 }
 0x2d0   : > { %p1116_p2 = por %p1115_p7, %p1114_p6 }
 0x2d1   : > { %p1112_p13 = pneg %p1111_p4 }
 0x2d2   : > { %p1118_p1 = por %p1117_p8, %p1116_p2 }
 0x2d4   : > { %p1119_p10 = pnand %p1118_p1, %p1112_p13 }
 0x2d6   : > { %1122 = shalt.err (!%p1119_p10)
}
 0x2d7   : > { %889 = dma.vmem_to_hbm [thread:$0]  (%p1508_p12), %s1441_s11, 128, %s1439_s8, %s680_s10  }
 0x2d8 PF: > { %s705_s9 = sand.u32 1, %s1161_s18   ;;  %p1509_p3 = scmp.ne.s32.totalorder %s1501_s29, 0 }
 0x2d9   : > { %p1510_p5 = scmp.ge.s32.totalorder %s1181_s23, 2  ;;  %s706_s15 = scalar_lea.sflag [#allocation6], %s705_s9 }
 0x2db   : > { %p903_p9 = pnand %p1510_p5, %p1509_p3 }
 0x2dd   : > { %1156 = dma.done.wait (!%p903_p9), %s706_s15, 128  }
 0x2de   : > { %1158 = vsyncadd (!%p903_p9), %s706_s15, 4294967168  ;;  %s22_s23 = sadd.s32 1, %s1181_s23   ;;  %s1511_s18 = smov %s1165_s19 }
 0x2df   : > { %p19_p11 = scmp.ge.s32.totalorder %s22_s23, 4   ;;  %s1512_s19 = smov %s1169_s20 }
 0x2e0   : > { %s1513_s20 = smov %s1364_s17  ;;  %s1514_s21 = smov %s1177_s22 }
 0x2e1   : > { %s1515_s22 = smov %s1517_s12  ;;  %21 = sbr.rel (!%p19_p11) target bundleno = 7 (0x7), region = 106 }
 0x2e8   :  { %711 = vsyncpa [#allocation5], 1 }
 0x2e9   :  { %713 = vsyncpa [#allocation5 + $0x1], 1 }
 0x2ea   :  { %714 = vsyncpa [#allocation8], 1 }
 0x2eb   :  { %715 = vsyncpa [#allocation6], 1 }
 0x2ec   :  { %717 = vsyncpa [#allocation6 + $0x1], 1 }

</bundles_post_ra>
